<compile_context>
chip_gen: v7x
topology: tpu7x:2x2x1
jax: 0.10.0
libtpu: 0.0.40
codegen_flags: <defaults>
</compile_context>

<pallas_src>
import jax
import jax.numpy as jnp
import numpy as np
from jax.experimental import pallas as pl
from jax.experimental.pallas import tpu as pltpu


# ---------------------------------------------------------------------------
# Kernel 1: text / image projections + L2 normalization (transposed layout).
# Outputs tnT (D1, B) f32, vnT (D2, B) f32, vnT_bf16 (D2, B) bf16.
# ---------------------------------------------------------------------------
def project_normalize_kernel(xtT_ref, wt_ref, bt_ref, xvT_ref, wv_ref, bv_ref,
                             tnT_ref, vnT_ref, vnT_bf16_ref):
    f32 = jnp.float32
    # tT[d, b] = sum_h Wt[d, h] * xt[b, h] + bt[d]   (PyTorch Linear, transposed)
    tT = jnp.dot(wt_ref[...], xtT_ref[...], preferred_element_type=f32) + bt_ref[...]
    vT = jnp.dot(wv_ref[...], xvT_ref[...], preferred_element_type=f32) + bv_ref[...]
    # F.normalize(p=2, dim=1, eps=1e-12) == x * rsqrt(max(sum(x^2), eps^2))
    t_inv = jax.lax.rsqrt(jnp.maximum(jnp.sum(tT * tT, axis=0, keepdims=True), 1e-24))
    v_inv = jax.lax.rsqrt(jnp.maximum(jnp.sum(vT * vT, axis=0, keepdims=True), 1e-24))
    vn = vT * v_inv
    tnT_ref[...] = tT * t_inv
    vnT_ref[...] = vn
    vnT_bf16_ref[...] = vn.astype(jnp.bfloat16)   # bf16 MXU operand for kernel 2


# ---------------------------------------------------------------------------
# Kernel 2: streamed bilinear pooling + pre_output MLP + output head.
# Grid = (batch blocks ["parallel"], K blocks over D1 ["arbitrary"]).
# wbp is streamed as (kb*Dout, D2) bf16 tiles; accT is the f32 accumulator.
# ---------------------------------------------------------------------------
def bilinear_head_kernel(tnT_ref, vnb_ref, wbp_ref, bbp_ref,
                         w1_ref, b1_ref, w2_ref, b2_ref, w3_ref, b3_ref,
                         wout_ref, bout_ref,
                         logits_ref, accT_ref):
    f32 = jnp.float32
    k = pl.program_id(1)
    dout = accT_ref.shape[0]
    kb = tnT_ref.shape[0]

    @pl.when(k == 0)
    def _init():
        accT_ref[...] = jnp.zeros_like(accT_ref)

    # One fused bf16 x bf16 MXU matmul per K step (f32 accumulation):
    #   p[i*Dout + o, b] = sum_j W[k0+i, o, j] * vn_bf16[j, b]
    p = jnp.dot(wbp_ref[...], vnb_ref[...], preferred_element_type=f32)
    # kb sublane-broadcast FMAs, accumulated straight into VMEM (bounded live range).
    for ii in range(kb):
        accT_ref[...] += tnT_ref[ii:ii + 1, :] * p[ii * dout:(ii + 1) * dout, :]

    @pl.when(k == pl.num_programs(1) - 1)
    def _finalize():
        # bilinear fc bias, then pre_output MLP.  Head weights live in VMEM as
        # bf16 and are cast once here (runs once per batch block).
        fusedT = accT_ref[...] + bbp_ref[...]                         # (Dout, bB)
        hT = jnp.maximum(jnp.dot(w1_ref[...].astype(f32), fusedT,
                                 preferred_element_type=f32) + b1_ref[...], 0.0)
        hT = jnp.maximum(jnp.dot(w2_ref[...].astype(f32), hT,
                                 preferred_element_type=f32) + b2_ref[...], 0.0)
        hT = jnp.maximum(jnp.dot(w3_ref[...].astype(f32), hT,
                                 preferred_element_type=f32) + b3_ref[...], 0.0)
        # dropout(rate=0.1) is identity in eval mode.
        # output Linear(D, 1): (1, D) @ (D, bB) -> (1, bB) lane-dense row.
        logits_ref[...] = (jnp.dot(wout_ref[...].astype(f32), hT,
                                   preferred_element_type=f32) + bout_ref[...])


def _largest_divisor_at_most(n, cap):
    cap = max(1, min(int(cap), int(n)))
    for d in range(cap, 0, -1):
        if n % d == 0:
            return d
    return 1


def _round_up(n, m):
    return ((n + m - 1) // m) * m


def _default_vmem_limit_bytes():
    """~100 MiB on 128-MiB-VMEM chips (v5e/v6e), ~48 MiB otherwise (v7x/unknown)."""
    try:
        cap = int(getattr(pltpu.get_tpu_info(), "vmem_capacity_bytes", 0))
    except Exception:
        cap = 0
    if cap >= 128 * 1024 * 1024:
        return 100 * 1024 * 1024
    return 48 * 1024 * 1024


def clip_classifier_forward(text_pooled, image_pooled, params, *,
                            k_block=8, batch_block=None, batch_align=128,
                            vmem_limit_bytes=None):
    """Returns (logits (B,), text_features (B,D), image_features (B,D)).

    k_block:     D1 rows of the bilinear weight per grid step.  Per-buffer bytes
                 = k_block * D * D * 2 (bf16).  Tuning: v5e ~8, v7x 8-12,
                 v6e 16-24 (128 MiB VMEM).
    batch_block: batch columns per grid step (outer "parallel" axis), rounded up
                 to `batch_align`.  Default = whole padded batch (one block),
                 which minimizes HBM re-streaming of the bilinear weight.
                 On v7x with large B pass ~ceil(B/2) so each TensorCore gets
                 exactly one block.
    batch_align: lane alignment for batch blocks (128; 256 fills the 256-wide
                 MXU on v6e/v7x for large batches).
    """
    f32 = jnp.float32
    batch = text_pooled.shape[0]
    dout = params["bbp"].shape[0]
    d2 = params["wbp"].shape[1]
    d1 = params["wbp"].shape[0] // dout

    # ---- batch padding: lane-dense batch blocks ------------------------------
    if batch_block is None:
        bb = _round_up(batch, batch_align)
    else:
        bb = _round_up(min(int(batch_block), _round_up(batch, batch_align)),
                       batch_align)
    b_pad = _round_up(batch, bb)
    n_b = b_pad // bb

    def pad_b(x):
        if x.shape[0] == b_pad:
            return x
        return jnp.pad(x, ((0, b_pad - x.shape[0]), (0, 0)))

    xtT = pad_b(text_pooled).T
    xvT = pad_b(image_pooled).T

    # ---- kernel 1: projections + normalize (tiny; whole-VMEM, no grid) -------
    vmem = pl.BlockSpec(memory_space=pltpu.MemorySpace.VMEM)
    tnT, vnT, vnT_bf16 = pl.pallas_call(
        project_normalize_kernel,
        out_shape=(jax.ShapeDtypeStruct((d1, b_pad), f32),
                   jax.ShapeDtypeStruct((d2, b_pad), f32),
                   jax.ShapeDtypeStruct((d2, b_pad), jnp.bfloat16)),
        in_specs=[vmem] * 6,
        out_specs=(vmem, vmem, vmem),
    )(xtT, params["wt"], params["bt"], xvT, params["wv"], params["bv"])

    # ---- kernel 2: streamed bilinear + MLP head -------------------------------
    kb = _largest_divisor_at_most(d1, k_block)
    n_k = d1 // kb
    if vmem_limit_bytes is None:
        vmem_limit_bytes = _default_vmem_limit_bytes()

    grid_spec = pltpu.PrefetchScalarGridSpec(
        num_scalar_prefetch=0,
        grid=(n_b, n_k),                                              # K innermost
        in_specs=[
            pl.BlockSpec((kb, bb), lambda b, k: (k, b)),              # tnT (D1,B)
            pl.BlockSpec((d2, bb), lambda b, k: (0, b)),              # vnT bf16
            pl.BlockSpec((kb * dout, d2), lambda b, k: (k, 0)),       # wbp stream
            pl.BlockSpec((dout, 1), lambda b, k: (0, 0)),             # bbp
            pl.BlockSpec((dout, dout), lambda b, k: (0, 0)),          # w1 (bf16)
            pl.BlockSpec((dout, 1), lambda b, k: (0, 0)),             # b1
            pl.BlockSpec((dout, dout), lambda b, k: (0, 0)),          # w2 (bf16)
            pl.BlockSpec((dout, 1), lambda b, k: (0, 0)),             # b2
            pl.BlockSpec((dout, dout), lambda b, k: (0, 0)),          # w3 (bf16)
            pl.BlockSpec((dout, 1), lambda b, k: (0, 0)),             # b3
            pl.BlockSpec((1, dout), lambda b, k: (0, 0)),             # wout (bf16)
            pl.BlockSpec((1, 1), lambda b, k: (0, 0)),                # bout
        ],
        out_specs=pl.BlockSpec((1, bb), lambda b, k: (0, b)),         # logits row
        scratch_shapes=[pltpu.VMEM((dout, bb), f32)],                 # f32 acc
    )
    logits_row = pl.pallas_call(
        bilinear_head_kernel,
        grid_spec=grid_spec,
        out_shape=jax.ShapeDtypeStruct((1, b_pad), f32),
        compiler_params=pltpu.CompilerParams(
            dimension_semantics=("parallel", "arbitrary"),
            vmem_limit_bytes=vmem_limit_bytes),
    )(tnT, vnT_bf16, params["wbp"], params["bbp"],
      params["w1"], params["b1"], params["w2"], params["b2"],
      params["w3"], params["b3"], params["wout"], params["bout"])

    # back to the module's (B, D) layout, dropping batch padding.
    return logits_row[0, :batch], tnT.T[:batch], vnT.T[:batch]


def init_params(key, text_hidden, vision_hidden, proj_dim):
    """Deterministic PyTorch-Linear-style init; weights stored kernel-ready."""

    def linear(k, fan_in, fan_out):
        k1, k2 = jax.random.split(k)
        bound = 1.0 / np.sqrt(fan_in)
        w = jax.random.uniform(k1, (fan_out, fan_in), jnp.float32, -bound, bound)
        b = jax.random.uniform(k2, (fan_out,), jnp.float32, -bound, bound)
        return w, b

    keys = jax.random.split(key, 7)
    wt, bt = linear(keys[0], text_hidden, proj_dim)
    wv, bv = linear(keys[1], vision_hidden, proj_dim)
    wbp, bbp = linear(keys[2], proj_dim * proj_dim, proj_dim)   # (Dout, D1*D2)
    w1, b1 = linear(keys[3], proj_dim, proj_dim)
    w2, b2 = linear(keys[4], proj_dim, proj_dim)
    w3, b3 = linear(keys[5], proj_dim, proj_dim)
    wout, bout = linear(keys[6], proj_dim, 1)

    d = proj_dim
    bf16 = jnp.bfloat16
    # bilinear fc weight (Dout, D1*D2) -> 2-D bf16 stream with
    # wbp2d[i*Dout + o, j] == W_fc[o, i*D2 + j]
    wbp2d = jnp.transpose(wbp.reshape(d, d, d), (1, 0, 2)).reshape(d * d, d)

    # log_temperature exists in the module but is unused in forward().
    return dict(
        # PyTorch (out, in) layout is exactly what the transposed kernels need.
        wt=wt, bt=bt[:, None],                       # (D, Ht), (D, 1)
        wv=wv, bv=bv[:, None],                       # (D, Hv), (D, 1)
        wbp=wbp2d.astype(bf16),                      # (D1*Dout, D2) bf16 HBM stream
        bbp=bbp[:, None],                            # (D, 1)
        w1=w1.astype(bf16), b1=b1[:, None],
        w2=w2.astype(bf16), b2=b2[:, None],
        w3=w3.astype(bf16), b3=b3[:, None],
        wout=wout.astype(bf16),                      # (1, D) bf16
        bout=bout[None, :],                          # (1, 1)
    )


def reference_forward(text_pooled, image_pooled, p):
    """Pure-JAX reference mirroring the PyTorch forward with the same bf16-stored
    bilinear/head weights and the same bf16 image-feature MXU operand."""
    f32 = jnp.float32
    t = text_pooled @ p["wt"].T + p["bt"][:, 0]
    v = image_pooled @ p["wv"].T + p["bv"][:, 0]
    tn = t / jnp.maximum(jnp.linalg.norm(t, axis=1, keepdims=True), 1e-12)
    vn = v / jnp.maximum(jnp.linalg.norm(v, axis=1, keepdims=True), 1e-12)
    d = tn.shape[1]
    vnb = vn.astype(jnp.bfloat16).astype(f32)        # kernel feeds bf16 vn to the MXU
    flat = (tn[:, :, None] * vnb[:, None, :]).reshape(tn.shape[0], d * d)
    # stored wbp[i*D + o, j] == W_fc[o, i*D + j]
    w3d = p["wbp"].astype(f32).reshape(d, d, d)               # (i, o, j)
    wflat = jnp.transpose(w3d, (0, 2, 1)).reshape(d * d, d)   # (i*D + j, o)
    fused = flat @ wflat + p["bbp"][:, 0]
    h = jnp.maximum(fused @ p["w1"].astype(f32).T + p["b1"][:, 0], 0.0)
    h = jnp.maximum(h @ p["w2"].astype(f32).T + p["b2"][:, 0], 0.0)
    h = jnp.maximum(h @ p["w3"].astype(f32).T + p["b3"][:, 0], 0.0)
    logits = h @ p["wout"].astype(f32)[0, :] + p["bout"][0, 0]
    return logits, tn, vn


if __name__ == "__main__":
    BATCH = 2
    TEXT_HIDDEN = 32     # stands in for CLIP text hidden_size (768)
    VISION_HIDDEN = 48   # stands in for CLIP vision hidden_size (1024)
    PROJ_DIM = 16        # stands in for projection_dim (768)

    root = jax.random.PRNGKey(0)
    k_params, k_text, k_img = jax.random.split(root, 3)
    params = init_params(k_params, TEXT_HIDDEN, VISION_HIDDEN, PROJ_DIM)

    # Synthetic pooled features standing in for clip_model.*_model(...).pooler_output
    text_pooled = jax.random.normal(k_text, (BATCH, TEXT_HIDDEN), jnp.float32)
    image_pooled = jax.random.normal(k_img, (BATCH, VISION_HIDDEN), jnp.float32)

    # k_block=8 -> 2 K-grid steps at PROJ_DIM=16, exercising the streamed
    # accumulator path that scales to the real 768-dim bilinear weight; the
    # batch is padded to 128 lanes so the logits/accumulator stores are lane-dense.
    logits, tfeat, ifeat = clip_classifier_forward(
        text_pooled, image_pooled, params, k_block=8)
    jax.block_until_ready((logits, tfeat, ifeat))

    ref_logits, ref_t, ref_v = reference_forward(text_pooled, image_pooled, params)
    np.testing.assert_allclose(np.asarray(logits), np.asarray(ref_logits),
                               rtol=5e-4, atol=1e-4)
    np.testing.assert_allclose(np.asarray(tfeat), np.asarray(ref_t),
                               rtol=5e-4, atol=1e-4)
    np.testing.assert_allclose(np.asarray(ifeat), np.asarray(ref_v),
                               rtol=5e-4, atol=1e-4)

    print("KERNEL_OK")
</pallas_src>

<mosaic_0001>
module attributes {stable_mosaic.version = 11 : i64} {
  func.func @project_normalize_kernel(%arg0: memref<32x128xf32, #tpu.memory_space<vmem>>, %arg1: memref<16x32xf32, #tpu.memory_space<vmem>>, %arg2: memref<16x1xf32, #tpu.memory_space<vmem>>, %arg3: memref<48x128xf32, #tpu.memory_space<vmem>>, %arg4: memref<16x48xf32, #tpu.memory_space<vmem>>, %arg5: memref<16x1xf32, #tpu.memory_space<vmem>>, %arg6: memref<16x128xf32, #tpu.memory_space<vmem>>, %arg7: memref<16x128xf32, #tpu.memory_space<vmem>>, %arg8: memref<16x128xbf16, #tpu.memory_space<vmem>>) attributes {dimension_semantics = [], scalar_prefetch = 0 : i64, scratch_operands = 0 : i64, tpu.core_type = #tpu.core_type<tc>} {
    %c0 = arith.constant 0 : index
    %c0_0 = arith.constant 0 : index
    %0 = vector.load %arg1[%c0, %c0_0] : memref<16x32xf32, #tpu.memory_space<vmem>>, vector<16x32xf32>
    %c0_1 = arith.constant 0 : index
    %c0_2 = arith.constant 0 : index
    %1 = vector.load %arg0[%c0_1, %c0_2] : memref<32x128xf32, #tpu.memory_space<vmem>>, vector<32x128xf32>
    %cst = arith.constant dense<0.000000e+00> : vector<16x128xf32>
    %2 = tpu.matmul %0, %1, %cst {dimension_numbers = #tpu.dot_dimension_numbers<[1], [0], [0], [1], [0, 0, 1, 1], [], []>} : vector<16x32xf32>, vector<32x128xf32>, vector<16x128xf32> -> vector<16x128xf32>
    %c0_3 = arith.constant 0 : index
    %c0_4 = arith.constant 0 : index
    %3 = vector.load %arg2[%c0_3, %c0_4] : memref<16x1xf32, #tpu.memory_space<vmem>>, vector<16x1xf32>
    %4 = vector.broadcast %3 : vector<16x1xf32> to vector<16x128xf32>
    %5 = arith.addf %2, %4 : vector<16x128xf32>
    %c0_5 = arith.constant 0 : index
    %c0_6 = arith.constant 0 : index
    %6 = vector.load %arg4[%c0_5, %c0_6] : memref<16x48xf32, #tpu.memory_space<vmem>>, vector<16x48xf32>
    %c0_7 = arith.constant 0 : index
    %c0_8 = arith.constant 0 : index
    %7 = vector.load %arg3[%c0_7, %c0_8] : memref<48x128xf32, #tpu.memory_space<vmem>>, vector<48x128xf32>
    %cst_9 = arith.constant dense<0.000000e+00> : vector<16x128xf32>
    %8 = tpu.matmul %6, %7, %cst_9 {dimension_numbers = #tpu.dot_dimension_numbers<[1], [0], [0], [1], [0, 0, 1, 1], [], []>} : vector<16x48xf32>, vector<48x128xf32>, vector<16x128xf32> -> vector<16x128xf32>
    %c0_10 = arith.constant 0 : index
    %c0_11 = arith.constant 0 : index
    %9 = vector.load %arg5[%c0_10, %c0_11] : memref<16x1xf32, #tpu.memory_space<vmem>>, vector<16x1xf32>
    %10 = vector.broadcast %9 : vector<16x1xf32> to vector<16x128xf32>
    %11 = arith.addf %8, %10 : vector<16x128xf32>
    %12 = arith.mulf %5, %5 : vector<16x128xf32>
    %cst_12 = arith.constant dense<0.000000e+00> : vector<128xf32>
    %13 = vector.multi_reduction <add>, %12, %cst_12 [0] : vector<16x128xf32> to vector<128xf32>
    %14 = vector.shape_cast %13 : vector<128xf32> to vector<1x128xf32>
    %cst_13 = arith.constant 1.000000e-24 : f32
    %15 = vector.broadcast %cst_13 : f32 to vector<1x128xf32>
    %16 = arith.maximumf %14, %15 : vector<1x128xf32>
    %17 = math.rsqrt %16 : vector<1x128xf32>
    %18 = arith.mulf %11, %11 : vector<16x128xf32>
    %cst_14 = arith.constant dense<0.000000e+00> : vector<128xf32>
    %19 = vector.multi_reduction <add>, %18, %cst_14 [0] : vector<16x128xf32> to vector<128xf32>
    %20 = vector.shape_cast %19 : vector<128xf32> to vector<1x128xf32>
    %cst_15 = arith.constant 1.000000e-24 : f32
    %21 = vector.broadcast %cst_15 : f32 to vector<1x128xf32>
    %22 = arith.maximumf %20, %21 : vector<1x128xf32>
    %23 = math.rsqrt %22 : vector<1x128xf32>
    %24 = vector.broadcast %23 : vector<1x128xf32> to vector<16x128xf32>
    %25 = arith.mulf %11, %24 : vector<16x128xf32>
    %26 = vector.broadcast %17 : vector<1x128xf32> to vector<16x128xf32>
    %27 = arith.mulf %5, %26 : vector<16x128xf32>
    %c0_16 = arith.constant 0 : index
    %c0_17 = arith.constant 0 : index
    %28 = vector.load %arg6[%c0_16, %c0_17] : memref<16x128xf32, #tpu.memory_space<vmem>>, vector<16x128xf32>
    tpu.vector_store %arg6[%c0_16, %c0_17], %27 {strides = array<i32>} : memref<16x128xf32, #tpu.memory_space<vmem>>, vector<16x128xf32>,
    %c0_18 = arith.constant 0 : index
    %c0_19 = arith.constant 0 : index
    %29 = vector.load %arg7[%c0_18, %c0_19] : memref<16x128xf32, #tpu.memory_space<vmem>>, vector<16x128xf32>
    tpu.vector_store %arg7[%c0_18, %c0_19], %25 {strides = array<i32>} : memref<16x128xf32, #tpu.memory_space<vmem>>, vector<16x128xf32>,
    %30 = arith.truncf %25 : vector<16x128xf32> to vector<16x128xbf16>
    %c0_20 = arith.constant 0 : index
    %c0_21 = arith.constant 0 : index
    %31 = vector.load %arg8[%c0_20, %c0_21] : memref<16x128xbf16, #tpu.memory_space<vmem>>, vector<16x128xbf16>
    tpu.vector_store %arg8[%c0_20, %c0_21], %30 {strides = array<i32>} : memref<16x128xbf16, #tpu.memory_space<vmem>>, vector<16x128xbf16>,
    return
  }
}

</mosaic_0001>

<bundles_post_ra>
// kernel: tpu_custom_call.1
= control target key start
LH: loop header
LB: loop body
LE: loop exit
PB: predicated region body
PF: predicated region fallthrough
CT: control target
= control target key end

     0   :  { %14 = vsyncpa [#allocation3], 0  ;;  %s722_s0 = inlined_call_operand.vmem [shape: f32[32,128], index: 0, kind: input, shape index: {}]   ;;  %s723_s1 = inlined_call_operand.hbm [shape: f32[16,32], index: 1, kind: input, shape index: {}]   ;;  %s724_s2 = inlined_call_operand.vmem [shape: f32[16,1], index: 2, kind: input, shape index: {}]   ;;  %s725_s3 = inlined_call_operand.hbm [shape: f32[48,128], index: 3, kind: input, shape index: {}]   ;;  %s726_s4 = inlined_call_operand.vmem [shape: f32[16,48], index: 4, kind: input, shape index: {}]   ;;  %s727_s5 = inlined_call_operand.vmem [shape: f32[16,1], index: 5, kind: input, shape index: {}]   ;;  %s728_s6 = inlined_call_operand.hbm [shape: f32[16,128], index: 6, kind: output, shape index: {0}]   ;;  %s729_s7 = inlined_call_operand.hbm [shape: f32[16,128], index: 7, kind: output, shape index: {1}]   ;;  %s730_s8 = inlined_call_operand.hbm [shape: bf16[16,128], index: 8, kind: output, shape index: {2}]  }
   0x1   :  { %15 = vsyncpa [#allocation6], 0 }
   0x2   :  { %16 = vsyncpa [#allocation4], 0 }
   0x3   :  { %17 = vsyncpa [#allocation9], 0  ;;  %s554_s27 = smov [#allocation2]   ;;  %s436_s9 = scalar_lea.hbm %s723_s1, 256 }
   0x4   :  { %s25_s28 = sshll.u32 %s554_s27, 4  ;;  %p437_p0 = scmp.ne.s32.totalorder %s723_s1, %s436_s9  ;;  %s26_s28 = int_to_ptr.vmem [resolvable:$true] %s25_s28 }
   0x5   :  { %p440_p1 = scmp.lt.u32.totalorder %s436_s9, %s723_s1 }
   0x7   :  { %p442_p2 = pnand %p440_p1, %p437_p0 }
   0x9   :  { %445 = shalt.err (!%p442_p2)
}
   0xa   :  { %s446_s14 = scalar_lea.vmem %s26_s28, 256  ;;  %p451_p4 = scmp.lt.s32.totalorder %s26_s28, %s26_s28 }
   0xb   :  { %p447_p3 = scmp.ne.s32.totalorder %s26_s28, %s446_s14  ;;  %p452_p5 = scmp.lt.s32.totalorder %s446_s14, %s446_s14 }
   0xd   :  { %p453_p6 = por %p452_p5, %p451_p4 }
   0xf   :  { %p454_p7 = pnand %p453_p6, %p447_p3 }
  0x11   :  { %457 = shalt.err (!%p454_p7)
}
  0x12   :  { %s555_s15 = smov 128   ;;  %s556_s16 = smov 8  }
  0x13   :  { %31 = dma.hbm_to_vmem [thread:$0]  %s723_s1, 256, %s26_s28, [#allocation3], %s555_s15, %s555_s15, %s556_s16  }
  0x14   :  { %s557_s19 = smov [#allocation5]   ;;  %s458_s23 = scalar_lea.hbm %s725_s3, 768 }
  0x15   :  { %s39_s20 = sshll.u32 %s557_s19, 4  ;;  %p459_p8 = scmp.ne.s32.totalorder %s725_s3, %s458_s23  ;;  %s40_s20 = int_to_ptr.vmem [resolvable:$true] %s39_s20 }
  0x16   :  { %p462_p9 = scmp.lt.u32.totalorder %s458_s23, %s725_s3 }
  0x18   :  { %p464_p10 = pnand %p462_p9, %p459_p8 }
  0x1a   :  { %467 = shalt.err (!%p464_p10)
}
  0x1b   :  { %s468_s29 = scalar_lea.vmem %s40_s20, 768  ;;  %p473_p12 = scmp.lt.s32.totalorder %s40_s20, %s40_s20 }
  0x1c   :  { %p469_p11 = scmp.ne.s32.totalorder %s40_s20, %s468_s29  ;;  %p474_p13 = scmp.lt.s32.totalorder %s468_s29, %s468_s29 }
  0x1e   :  { %p475_p0 = por %p474_p13, %p473_p12 }
  0x20   :  { %p476_p1 = pnand %p475_p0, %p469_p11 }
  0x22   :  { %479 = shalt.err (!%p476_p1)
}
  0x23   :  { %45 = dma.hbm_to_vmem [thread:$0]  %s725_s3, 768, %s40_s20, [#allocation6], %s555_s15, %s555_s15, %s556_s16  }
  0x24   :  { %546 = dma.done.wait [#allocation3], 256  }
  0x25   :  { %547 = vsyncadd [#allocation3], 4294967040 }
  0x26   :  { %548 = dma.done.wait [#allocation6], 768  }
  0x27   :  { %549 = vsyncadd [#allocation6], 4294966528  ;;  %v558_v0 = vmov 0   ;;  %v58_v1 = vld [vmem:[%s722_s0] sm:$0xff]  ;;  %v59_v2 = vld [vmem:[%s722_s0 + $0x8] sm:$0xff]  ;;  %vm74_vm0 = vcmask 261120  }
  0x28   :  { %431 = vset.pattern.permute.xlu1 %v558_v0  ;;  %430 = vset.pattern.permute.xlu0 %v558_v0  ;;  %v158_v3 = vld [vmem:[#allocation5] sm:$0xff]  ;;  %v400_v4 = vpack.c.bf16 %v59_v2, %v58_v1  ;;  %v159_v5 = vld [vmem:[#allocation5 + $0x8] sm:$0xff]  ;;  %v160_v10 = vld [vmem:[#allocation5 + $0x10] sm:$0xff]  ;;  %vm176_vm1 = vcmask 392192  }
  0x29   :  { %v60_v6 = vld [vmem:[%s722_s0 + $0x10] sm:$0xff]  ;;  %v61_v7 = vld [vmem:[%s722_s0 + $0x18] sm:$0xff]  ;;  %v408_v8 = vpack.c.bf16 %v159_v5, %v158_v3  ;;  %v161_v11 = vld [vmem:[#allocation5 + $0x18] sm:$0xff] }
  0x2a   :  { %v404_v9 = vpack.c.bf16 %v61_v7, %v60_v6  ;;  %v56_v12 = vld [vmem:[#allocation2] sm:$0xff]  ;;  %401 = vmatprep.subr.bf16.mxu0 %v400_v4  ;;  %v412_v13 = vpack.c.bf16 %v161_v11, %v160_v10  ;;  %v162_v14 = vld [vmem:[#allocation5 + $0x20] sm:$0xff]  ;;  %v163_v15 = vld [vmem:[#allocation5 + $0x28] sm:$0xff] }
  0x2b   :  { %382 = vmatprep.mubr.msk.f32.mxu0 %vm74_vm0, %v56_v12  ;;  %409 = vmatprep.subr.bf16.mxu1 %v408_v8  ;;  %v156_v16 = vld [vmem:[%s726_s4] sm:$0xff]  ;;  %v416_v19 = vpack.c.bf16 %v163_v15, %v162_v14  ;;  %v57_v20 = vld [vmem:[#allocation2 + $0x8] sm:$0xff] }
  0x2c   :  { %403 = vmatpush3.bf16.msra.mxu0 %v400_v4  ;;  %v164_v17 = vld [vmem:[%s727_s5] sm:$0xff]  ;;  %411 = vmatpush3.bf16.msra.mxu1 %v408_v8  ;;  %v165_v21 = vld [vmem:[%s727_s5 + $0x8] sm:$0xff]  ;;  %s560_s5 = smov [#allocation8]  }
  0x2d   :  { %405 = vmatprep.subr.bf16.mxu0 %v404_v9  ;;  %v62_v18 = vld [vmem:[%s724_s2] sm:$0xff]  ;;  %413 = vmatprep.subr.bf16.mxu1 %v412_v13  ;;  %v63_v22 = vld [vmem:[%s724_s2 + $0x8] sm:$0xff]  ;;  %s559_s2 = smov [#allocation7]   ;;  %s315_s29 = sshll.u32 %s560_s5, 4  ;;  %s316_s29 = int_to_ptr.vmem [resolvable:$true] %s315_s29 }
  0x2e   :  { %397 = vmatprep.mubr.msk.f32.mxu1 %vm176_vm1, %v156_v16  ;;  %168 = vperm.xlu0 %430, %v164_v17   ;;  %v157_v23 = vld [vmem:[%s726_s4 + $0x8] sm:$0xff]  ;;  %s303_s4 = sshll.u32 %s559_s2, 4  ;;  %s304_s4 = int_to_ptr.vmem [resolvable:$true] %s303_s4 }
  0x2f   :  { %66 = vperm.xlu1 %431, %v62_v18   ;;  %s480_s1 = scalar_lea.vmem %s304_s4, 256  ;;  %p485_p3 = scmp.lt.s32.totalorder %s304_s4, %s304_s4 }
  0x30   :  { %407 = vmatpush3.bf16.msra.mxu0 %v404_v9  ;;  %415 = vmatpush3.bf16.msra.mxu1 %v412_v13  ;;  %p481_p2 = scmp.ne.s32.totalorder %s304_s4, %s480_s1  ;;  %p486_p4 = scmp.lt.s32.totalorder %s480_s1, %s480_s1 }
  0x31   :  { %417 = vmatprep.subr.bf16.mxu1 %v416_v19 }
  0x32   :  { %173 = vperm.xlu0 %430, %v165_v21   ;;  %p487_p5 = por %p486_p4, %p485_p3 }
  0x33   :  { %383 = vmatmul.mubr.msk.f32.vlgmr.msra.gmra.mrb[0].mxu0 %vm74_vm0, %v57_v20  ;;  %71 = vperm.xlu1 %431, %v63_v22  }
  0x34   :  { %419 = vmatpush3.bf16.msra.mxu1 %v416_v19  ;;  %p488_p6 = pnand %p487_p5, %p481_p2 }
  0x37   :  { %398 = vmatmul.mubr.msk.f32.vlgmr.msra.gmra.mrb[0].mxu1 %vm176_vm1, %v157_v23 }
  0xad   :  { %v169_v26 = vpop.permute.xlu0 %168 }
  0xae   :  { %v67_v24 = vpop.permute.xlu1 %66 }
  0xb1   :  { %v174_v33 = vpop.permute.xlu0 %173 }
  0xb2   :  { %v72_v25 = vpop.permute.xlu1 %71 }
 0x106   :  { %v384_v27 = vpop.f32.mrb[0].mxu0 }
 0x107   :  { %v153_v28 = vadd.f32 %v384_v27, %v72_v25  ;;  %v147_v29 = vpop.f32.mrb[1].mxu0 }
 0x108   :  { %v148_v30 = vadd.f32 %v147_v29, %v67_v24 }
 0x109   :  { %v259_v31 = vmul.f32 %v153_v28, %v153_v28 }
 0x10a   :  { %v258_v32 = vmul.f32 %v148_v30, %v148_v30  ;;  %v399_v34 = vpop.f32.mrb[0].mxu1 }
 0x10b   :  { %v255_v36 = vadd.f32 %v399_v34, %v174_v33  ;;  %v249_v37 = vpop.f32.mrb[1].mxu1 }
 0x10c   :  { %v260_v35 = vadd.f32 %v259_v31, %v258_v32  ;;  %v250_v38 = vadd.f32 %v249_v37, %v169_v26 }
 0x10d   :  { %v270_v40 = vmul.f32 %v255_v36, %v255_v36 }
 0x10e   :  { %v261_v39 = vrot.slane %v260_v35, 4  ;;  %v269_v41 = vmul.f32 %v250_v38, %v250_v38 }
 0x110   :  { %v262_v42 = vadd.f32 %v261_v39, %v260_v35  ;;  %v271_v43 = vadd.f32 %v270_v40, %v269_v41 }
 0x112   :  { %v263_v44 = vrot.slane %v262_v42, 2  ;;  %v272_v45 = vrot.slane %v271_v43, 4 }
 0x114   :  { %v264_v46 = vadd.f32 %v263_v44, %v262_v42  ;;  %v273_v47 = vadd.f32 %v272_v45, %v271_v43 }
 0x116   :  { %v265_v48 = vrot.slane %v264_v46, 1  ;;  %v274_v49 = vrot.slane %v273_v47, 2 }
 0x118   :  { %v266_v50 = vadd.f32 %v265_v48, %v264_v46  ;;  %v275_v51 = vadd.f32 %v274_v49, %v273_v47 }
 0x11a   :  { %v267_v52 = vmax.f32 %v266_v50, 1e-24  ;;  %v276_v53 = vrot.slane %v275_v51, 1 }
 0x11c   :  { %432 = vrsqrt.f32 %v267_v52  ;;  %v277_v54 = vadd.f32 %v276_v53, %v275_v51 }
 0x11e   :  { %v278_v55 = vmax.f32 %v277_v54, 1e-24 }
 0x120   :  { %434 = vrsqrt.f32 %v278_v55 }
 0x126   :  { %v433_v56 = vpop.eup %432 }
 0x127   :  { %v282_v57 = vmul.f32 %v433_v56, %v148_v30  ;;  %v283_v58 = vmul.f32 %v433_v56, %v153_v28 }
 0x129   :  { %284 = vst [vmem:[#allocation7] sm:$0xff] %v282_v57  ;;  %285 = vst [vmem:[#allocation7 + $0x8] sm:$0xff] %v283_v58 }
 0x12a   :  { %491 = shalt.err (!%p488_p6)
}
 0x12b   :  { %s492_s9 = scalar_lea.hbm %s728_s6, 256 }
 0x12c   :  { %p493_p7 = scmp.ne.s32.totalorder %s728_s6, %s492_s9  ;;  %p496_p8 = scmp.lt.u32.totalorder %s492_s9, %s728_s6 }
 0x12e   :  { %p498_p9 = pnand %p496_p8, %p493_p7 }
 0x130   :  { %501 = shalt.err (!%p498_p9)
}
 0x131   :  { %309 = dma.vmem_to_hbm [thread:$0]  %s304_s4, 256, %s728_s6, [#allocation4], %s555_s15, %s555_s15, %s556_s16   ;;  %v435_v59 = vpop.eup %434 }
 0x132   :  { %s561_s17 = smov [#allocation10]   ;;  %v280_v60 = vmul.f32 %v435_v59, %v250_v38  ;;  %v281_v61 = vmul.f32 %v435_v59, %v255_v36  ;;  %s502_s19 = scalar_lea.vmem %s316_s29, 256 }
 0x133   :  { %s327_s18 = sshll.u32 %s561_s17, 4  ;;  %p503_p10 = scmp.ne.s32.totalorder %s316_s29, %s502_s19  ;;  %s688_s18 = int_to_ptr.vmem [resolvable:$true] %s327_s18 }
 0x134   :  { %v358_v62 = vpack.c.bf16 %v281_v61, %v280_v60  ;;  %286 = vst [vmem:[#allocation8] sm:$0xff] %v280_v60  ;;  %287 = vst [vmem:[#allocation8 + $0x8] sm:$0xff] %v281_v61  ;;  %p507_p11 = scmp.lt.s32.totalorder %s316_s29, %s316_s29  ;;  %p508_p12 = scmp.lt.s32.totalorder %s502_s19, %s502_s19 }
 0x136   :  { %p509_p13 = por %p508_p12, %p507_p11 }
 0x138   :  { %p510_p0 = pnand %p509_p13, %p503_p10 }
 0x13a   :  { %513 = shalt.err (!%p510_p0)
}
 0x13b   :  { %s514_s20 = scalar_lea.hbm %s729_s7, 256 }
 0x13c   :  { %p515_p1 = scmp.ne.s32.totalorder %s729_s7, %s514_s20  ;;  %p518_p2 = scmp.lt.u32.totalorder %s514_s20, %s729_s7 }
 0x13e   :  { %p520_p3 = pnand %p518_p2, %p515_p1 }
 0x140   :  { %523 = shalt.err (!%p520_p3)
}
 0x141   :  { %321 = dma.vmem_to_hbm [thread:$0]  %s316_s29, 256, %s729_s7, [#allocation9], %s555_s15, %s555_s15, %s556_s16   ;;  %359 = vst [vmem:[#allocation10] sm:$0xff] %v358_v62  }
 0x142   :  { %s524_s27 = scalar_lea.vmem %s688_s18, 128  ;;  %p529_p5 = scmp.lt.s32.totalorder %s688_s18, %s688_s18 }
 0x143   :  { %p525_p4 = scmp.ne.s32.totalorder %s688_s18, %s524_s27  ;;  %p530_p6 = scmp.lt.s32.totalorder %s524_s27, %s524_s27 }
 0x145   :  { %p531_p7 = por %p530_p6, %p529_p5 }
 0x147   :  { %p532_p8 = pnand %p531_p7, %p525_p4 }
 0x149   :  { %535 = shalt.err (!%p532_p8)
}
 0x14a   :  { %s536_s5 = scalar_lea.hbm %s730_s8, 128 }
 0x14b   :  { %p537_p9 = scmp.ne.s32.totalorder %s730_s8, %s536_s5  ;;  %p540_p10 = scmp.lt.u32.totalorder %s536_s5, %s730_s8 }
 0x14d   :  { %p542_p11 = pnand %p540_p10, %p537_p9 }
 0x14f   :  { %545 = shalt.err (!%p542_p11)
}
 0x150   :  { %s562_s7 = smov 64   ;;  %s563_s15 = smov 4  }
 0x151   :  { %333 = dma.vmem_to_hbm [thread:$0]  %s688_s18, 128, %s730_s8, [#allocation9], %s562_s7, %s562_s7, %s563_s15  }
 0x152   :  { %550 = dma.done.wait [#allocation4], 256  }
 0x153   :  { %551 = vsyncadd [#allocation4], 4294967040 }
 0x154   :  { %552 = dma.done.wait [#allocation9], 384  }
 0x155   :  { %553 = vsyncadd [#allocation9], 4294966912 }
 0x156   :  { %343 = vsyncpa [#allocation3], 1 }
 0x157   :  { %344 = vsyncpa [#allocation6], 1 }
 0x158   :  { %345 = vsyncpa [#allocation4], 1 }
 0x159   :  { %346 = vsyncpa [#allocation9], 1 }

</bundles_post_ra>
